<compile_context>
chip_gen: v7x
topology: tpu7x:2x2x1
jax: 0.10.0
libtpu: 0.0.40
codegen_flags: <defaults>
</compile_context>

<pallas_src>
import functools

import jax
import jax.numpy as jnp
from jax.experimental import pallas as pl
from jax.experimental.pallas import tpu as pltpu


# ---------------------------------------------------------------------------
# Elementwise focal loss
# ---------------------------------------------------------------------------
def _int_pow(x, e):
    """x**e for a small non-negative integer e, unrolled at trace time (VPU)."""
    if e == 0:
        return jnp.ones_like(x)
    acc = None
    base = x
    while e > 0:
        if e & 1:
            acc = base if acc is None else acc * base
        e >>= 1
        if e:
            base = base * base
    return acc


def _focal_elementwise(x, t, alpha, gamma):
    # Numerically stable BCE-with-logits (same formula PyTorch uses):
    #   bce = max(x, 0) - x*t + log1p(exp(-|x|))
    bce = jnp.maximum(x, 0.0) - x * t + jnp.log1p(jnp.exp(-jnp.abs(x)))
    # pt = exp(-bce); kept as exp(-bce) so soft (non 0/1) targets stay exact.
    pt = jnp.exp(-bce)
    one_minus_pt = 1.0 - pt
    g = float(gamma)
    if g == int(g) and 0 <= int(g) <= 16:
        # gamma=2 default: (1-pt)*(1-pt) -- avoids pow -> exp(gamma*log(.)) EUP work.
        mod = _int_pow(one_minus_pt, int(g))
    else:
        mod = one_minus_pt ** g
    out = mod * bce
    if float(alpha) != 1.0:
        out = alpha * out
    return out


# ---------------------------------------------------------------------------
# Kernels
# ---------------------------------------------------------------------------
def _focal_partial_kernel(x_ref, t_ref, psum_ref, *, alpha, gamma,
                          n_rows, tile_rows, mask_rows):
    """One (tile_rows, L) block -> one (8, L) lane-dense partial sum.

    Grid axis 0 is 'parallel' (independent per-tile output blocks), so on v7x
    both TensorCores participate. The fold to (8, L) is pure VPU vreg adds; no
    per-step cross-lane XLU reduce and no SMEM scalar round-trip.
    """
    x = x_ref[...].astype(jnp.float32)
    t = t_ref[...].astype(jnp.float32)
    focal = _focal_elementwise(x, t, alpha, gamma)
    if mask_rows:
        row = (jax.lax.broadcasted_iota(jnp.int32, focal.shape, 0)
               + pl.program_id(0) * tile_rows)
        focal = jnp.where(row < n_rows, focal, 0.0)
    l = focal.shape[-1]
    # (tile_rows, L) -> (tile_rows//8, 8, L): splits whole vreg rows, no copy.
    psum_ref[...] = jnp.sum(focal.reshape(tile_rows // 8, 8, l), axis=0)


def _focal_none_kernel(x_ref, t_ref, o_ref, *, alpha, gamma):
    x = x_ref[...].astype(jnp.float32)
    t = t_ref[...].astype(jnp.float32)
    o_ref[...] = _focal_elementwise(x, t, alpha, gamma).astype(o_ref.dtype)


# ---------------------------------------------------------------------------
# Wrapper
# ---------------------------------------------------------------------------
def _sublane_multiple(dtype):
    itemsize = jnp.dtype(dtype).itemsize
    return max(8, (4 // max(1, itemsize)) * 8)   # f32->8, bf16->16, int8/fp8->32


def _round_up(x, m):
    return ((x + m - 1) // m) * m


def _pick_tile_rows(n, l, dtype, target_block_bytes):
    """Largest row tile whose block stays near `target_block_bytes`, aligned to
    the dtype sublane packing, and never larger than the (rounded-up) batch."""
    sub = _sublane_multiple(dtype)
    itemsize = jnp.dtype(dtype).itemsize
    rows = target_block_bytes // max(1, l * itemsize)
    rows = max(sub, (rows // sub) * sub)
    return min(rows, _round_up(n, sub))


def multi_label_focal_loss(inputs, targets, *, alpha=1.0, gamma=2.0,
                           reduction="mean", tile_rows=None,
                           target_block_bytes=2 << 20):
    """inputs/targets: (N, L) arrays; returns scalar (mean/sum) or (N, L)."""
    assert inputs.shape == targets.shape and inputs.ndim == 2
    n, l = inputs.shape
    if tile_rows is None:
        tile_rows = _pick_tile_rows(n, l, inputs.dtype, target_block_bytes)
    num_tiles = pl.cdiv(n, tile_rows)
    grid = (num_tiles,)

    in_specs = [
        pl.BlockSpec((tile_rows, l), lambda i: (i, 0)),
        pl.BlockSpec((tile_rows, l), lambda i: (i, 0)),
    ]

    # Working set: double-buffered inputs (+ output in the 'none' path).
    block_bytes = tile_rows * l * jnp.dtype(inputs.dtype).itemsize
    n_bufs = 6 if reduction == "none" else 4
    # Raise the scoped VMEM limit to cover the bigger tiles; cap at 64 MiB so
    # the same tiling stays valid on v7x (64 MiB physical per TC).
    vmem_limit = int(min(64 << 20, max(32 << 20, n_bufs * block_bytes + (4 << 20))))
    cparams = pltpu.CompilerParams(
        dimension_semantics=("parallel",),
        vmem_limit_bytes=vmem_limit,
    )

    if reduction == "none":
        kern = functools.partial(_focal_none_kernel,
                                 alpha=float(alpha), gamma=float(gamma))
        return pl.pallas_call(
            kern,
            out_shape=jax.ShapeDtypeStruct((n, l), inputs.dtype),
            grid=grid,
            in_specs=in_specs,
            out_specs=pl.BlockSpec((tile_rows, l), lambda i: (i, 0)),
            compiler_params=cparams,
        )(inputs, targets)

    if reduction == "mean":
        scale = 1.0 / float(n * l)
    elif reduction == "sum":
        scale = 1.0
    else:
        raise ValueError(f"unknown reduction: {reduction}")

    kern = functools.partial(
        _focal_partial_kernel, alpha=float(alpha), gamma=float(gamma),
        n_rows=n, tile_rows=tile_rows, mask_rows=(n % tile_rows != 0))
    partials = pl.pallas_call(
        kern,
        out_shape=jax.ShapeDtypeStruct((num_tiles * 8, l), jnp.float32),
        grid=grid,
        in_specs=in_specs,
        out_specs=pl.BlockSpec((8, l), lambda i: (i, 0)),
        compiler_params=cparams,
    )(inputs, targets)
    # Tiny cross-lane / cross-tile finish (num_tiles*8 x L f32 elements).
    return jnp.sum(partials) * scale


# ---------------------------------------------------------------------------
# Reference + test
# ---------------------------------------------------------------------------
def _reference(inputs, targets, alpha=1.0, gamma=2.0, reduction="mean"):
    x = inputs.astype(jnp.float32)
    t = targets.astype(jnp.float32)
    bce = jnp.maximum(x, 0.0) - x * t + jnp.log1p(jnp.exp(-jnp.abs(x)))
    pt = jnp.exp(-bce)
    focal = alpha * (1.0 - pt) ** gamma * bce
    if reduction == "mean":
        return jnp.mean(focal)
    if reduction == "sum":
        return jnp.sum(focal)
    return focal


if __name__ == "__main__":
    key = jax.random.PRNGKey(0)
    k1, k2, k3, k4 = jax.random.split(key, 4)

    # Small multi-label classification shapes: batch=16, labels=128.
    N, L = 16, 128
    logits = jax.random.normal(k1, (N, L), dtype=jnp.float32) * 2.0
    targets = (jax.random.uniform(k2, (N, L)) > 0.5).astype(jnp.float32)

    # mean (default module behavior) — auto tile picks a single block here.
    loss = multi_label_focal_loss(logits, targets, alpha=1, gamma=2,
                                  reduction="mean")
    loss = jax.block_until_ready(loss)
    ref = _reference(logits, targets, 1.0, 2.0, "mean")
    assert jnp.allclose(loss, ref, rtol=1e-5, atol=1e-6), (loss, ref)

    # sum, multi-tile grid with a partial (masked) last tile.
    N2 = 40
    logits2 = jax.random.normal(k3, (N2, L), dtype=jnp.float32) * 2.0
    targets2 = (jax.random.uniform(k4, (N2, L)) > 0.5).astype(jnp.float32)
    loss2 = multi_label_focal_loss(logits2, targets2, alpha=1, gamma=2,
                                   reduction="sum", tile_rows=16)
    loss2 = jax.block_until_ready(loss2)
    ref2 = _reference(logits2, targets2, 1.0, 2.0, "sum")
    assert jnp.allclose(loss2, ref2, rtol=1e-5, atol=1e-4), (loss2, ref2)

    # none (elementwise output, same dtype as input).
    elems = multi_label_focal_loss(logits, targets, alpha=1, gamma=2,
                                   reduction="none")
    elems = jax.block_until_ready(elems)
    ref3 = _reference(logits, targets, 1.0, 2.0, "none")
    assert elems.shape == (N, L) and elems.dtype == logits.dtype
    assert jnp.allclose(elems, ref3, rtol=1e-5, atol=1e-6)

    print("KERNEL_OK")
</pallas_src>

<mosaic_0001>
module attributes {stable_mosaic.version = 11 : i64} {
  func.func @_focal_partial_kernel(%arg0: i32, %arg1: memref<16x128xf32, #tpu.memory_space<vmem>>, %arg2: memref<16x128xf32, #tpu.memory_space<vmem>>, %arg3: memref<8x128xf32, #tpu.memory_space<vmem>>) attributes {dimension_semantics = [#tpu.dimension_semantics<parallel>], iteration_bounds = array<i64: 1>, scalar_prefetch = 0 : i64, scratch_operands = 0 : i64, tpu.core_type = #tpu.core_type<tc>, window_params = [{transform_indices = @transform_0, window_bounds = array<i64: 16, 128>}, {transform_indices = @transform_1, window_bounds = array<i64: 16, 128>}, {transform_indices = @transform_2, window_bounds = array<i64: 8, 128>}]} {
    %c0 = arith.constant 0 : index
    %c0_0 = arith.constant 0 : index
    %0 = vector.load %arg1[%c0, %c0_0] : memref<16x128xf32, #tpu.memory_space<vmem>>, vector<16x128xf32>
    %c0_1 = arith.constant 0 : index
    %c0_2 = arith.constant 0 : index
    %1 = vector.load %arg2[%c0_1, %c0_2] : memref<16x128xf32, #tpu.memory_space<vmem>>, vector<16x128xf32>
    %cst = arith.constant 0.000000e+00 : f32
    %2 = vector.broadcast %cst : f32 to vector<16x128xf32>
    %3 = arith.maximumf %0, %2 : vector<16x128xf32>
    %4 = arith.mulf %0, %1 : vector<16x128xf32>
    %5 = arith.subf %3, %4 : vector<16x128xf32>
    %6 = math.absf %0 : vector<16x128xf32>
    %cst_3 = arith.constant 0.000000e+00 : f32
    %7 = vector.broadcast %cst_3 : f32 to vector<16x128xf32>
    %8 = arith.subf %7, %6 : vector<16x128xf32>
    %9 = math.exp %8 : vector<16x128xf32>
    %10 = math.log1p %9 : vector<16x128xf32>
    %11 = arith.addf %5, %10 : vector<16x128xf32>
    %cst_4 = arith.constant 0.000000e+00 : f32
    %12 = vector.broadcast %cst_4 : f32 to vector<16x128xf32>
    %13 = arith.subf %12, %11 : vector<16x128xf32>
    %14 = math.exp %13 : vector<16x128xf32>
    %cst_5 = arith.constant 1.000000e+00 : f32
    %15 = vector.broadcast %cst_5 : f32 to vector<16x128xf32>
    %16 = arith.subf %15, %14 : vector<16x128xf32>
    %17 = arith.mulf %16, %16 : vector<16x128xf32>
    %18 = arith.mulf %17, %11 : vector<16x128xf32>
    %19 = vector.shape_cast %18 : vector<16x128xf32> to vector<2x8x128xf32>
    %cst_6 = arith.constant dense<0.000000e+00> : vector<8x128xf32>
    %20 = vector.multi_reduction <add>, %19, %cst_6 [0] : vector<2x8x128xf32> to vector<8x128xf32>
    %c0_7 = arith.constant 0 : index
    %c0_8 = arith.constant 0 : index
    %21 = vector.load %arg3[%c0_7, %c0_8] : memref<8x128xf32, #tpu.memory_space<vmem>>, vector<8x128xf32>
    tpu.vector_store %arg3[%c0_7, %c0_8], %20 {strides = array<i32>} : memref<8x128xf32, #tpu.memory_space<vmem>>, vector<8x128xf32>,
    return
  }
  func.func @transform_0(%arg0: i32) -> (i32, i32) {
    %c0_i32 = arith.constant 0 : i32
    %c0_i32_0 = arith.constant 0 : i32
    return %arg0, %c0_i32 : i32, i32
  }
  func.func @transform_1(%arg0: i32) -> (i32, i32) {
    %c0_i32 = arith.constant 0 : i32
    %c0_i32_0 = arith.constant 0 : i32
    return %arg0, %c0_i32 : i32, i32
  }
  func.func @transform_2(%arg0: i32) -> (i32, i32) {
    %c0_i32 = arith.constant 0 : i32
    %c0_i32_0 = arith.constant 0 : i32
    return %arg0, %c0_i32 : i32, i32
  }
}

</mosaic_0001>

<bundles_post_ra>
// kernel: tpu_custom_call.1
= control target key start
LH: loop header
LB: loop body
LE: loop exit
PB: predicated region body
PF: predicated region fallthrough
CT: control target
= control target key end

     0   :  { %7 = vsyncpa [#allocation3], 0  ;;  %s253_s0 = inlined_call_operand.hbm [shape: f32[16,128], index: 0, kind: input, shape index: {}]   ;;  %s254_s1 = inlined_call_operand.hbm [shape: f32[16,128], index: 1, kind: input, shape index: {}]   ;;  %s255_s2 = inlined_call_operand.hbm [shape: f32[8,128], index: 2, kind: output, shape index: {}]  }
   0x1   :  { %8 = vsyncpa [#allocation6], 0 }
   0x2   :  { %9 = vsyncpa [#allocation4], 0  ;;  %s197_s9 = smov [#allocation2]   ;;  %s125_s13 = scalar_lea.hbm %s253_s0, 256 }
   0x3   :  { %s15_s10 = sshll.u32 %s197_s9, 4  ;;  %p126_p0 = scmp.ne.s32.totalorder %s253_s0, %s125_s13  ;;  %s16_s10 = int_to_ptr.vmem [resolvable:$true] %s15_s10 }
   0x4   :  { %p129_p1 = scmp.lt.u32.totalorder %s125_s13, %s253_s0 }
   0x6   :  { %p131_p2 = pnand %p129_p1, %p126_p0 }
   0x8   :  { %134 = shalt.err (!%p131_p2)
}
   0x9   :  { %s135_s18 = scalar_lea.vmem %s16_s10, 256  ;;  %p140_p4 = scmp.lt.s32.totalorder %s16_s10, %s16_s10 }
   0xa   :  { %p136_p3 = scmp.ne.s32.totalorder %s16_s10, %s135_s18  ;;  %p141_p5 = scmp.lt.s32.totalorder %s135_s18, %s135_s18 }
   0xc   :  { %p142_p6 = por %p141_p5, %p140_p4 }
   0xe   :  { %p143_p7 = pnand %p142_p6, %p136_p3 }
  0x10   :  { %146 = shalt.err (!%p143_p7)
}
  0x11   :  { %s198_s19 = smov 128   ;;  %s199_s20 = smov 8  }
  0x12   :  { %21 = dma.hbm_to_vmem [thread:$0]  %s253_s0, 256, %s16_s10, [#allocation3], %s198_s19, %s198_s19, %s199_s20  }
  0x13   :  { %s200_s23 = smov [#allocation5]   ;;  %s147_s27 = scalar_lea.hbm %s254_s1, 256 }
  0x14   :  { %s27_s24 = sshll.u32 %s200_s23, 4  ;;  %p148_p8 = scmp.ne.s32.totalorder %s254_s1, %s147_s27  ;;  %s28_s24 = int_to_ptr.vmem [resolvable:$true] %s27_s24 }
  0x15   :  { %p151_p9 = scmp.lt.u32.totalorder %s147_s27, %s254_s1 }
  0x17   :  { %p153_p10 = pnand %p151_p9, %p148_p8 }
  0x19   :  { %156 = shalt.err (!%p153_p10)
}
  0x1a   :  { %s157_s4 = scalar_lea.vmem %s28_s24, 256  ;;  %p162_p12 = scmp.lt.s32.totalorder %s28_s24, %s28_s24 }
  0x1b   :  { %p158_p11 = scmp.ne.s32.totalorder %s28_s24, %s157_s4  ;;  %p163_p13 = scmp.lt.s32.totalorder %s157_s4, %s157_s4 }
  0x1d   :  { %p164_p0 = por %p163_p13, %p162_p12 }
  0x1f   :  { %p165_p1 = pnand %p164_p0, %p158_p11 }
  0x21   :  { %168 = shalt.err (!%p165_p1)
}
  0x22   :  { %33 = dma.hbm_to_vmem [thread:$0]  %s254_s1, 256, %s28_s24, [#allocation6], %s198_s19, %s198_s19, %s199_s20  }
  0x23   :  { %191 = dma.done.wait [#allocation3], 256  }
  0x24   :  { %192 = vsyncadd [#allocation3], 4294967040 }
  0x25   :  { %193 = dma.done.wait [#allocation6], 256  }
  0x26   :  { %194 = vsyncadd [#allocation6], 4294967040  ;;  %v40_v0 = vld [vmem:[#allocation2] sm:$0xff]  ;;  %v41_v1 = vld [vmem:[#allocation2 + $0x8] sm:$0xff]  ;;  %s201_s1 = smov [#allocation7]  }
  0x27   :  { %v50_v2 = vand.u32 2147483647, %v40_v0  ;;  %v51_v3 = vand.u32 2147483647, %v41_v1  ;;  %v42_v14 = vld [vmem:[#allocation5] sm:$0xff]  ;;  %v43_v15 = vld [vmem:[#allocation5 + $0x8] sm:$0xff] }
  0x28   :  { %v44_v17 = vmax.f32 %v40_v0, 0.0  ;;  %v46_v18 = vmul.f32 %v42_v14, %v40_v0  ;;  %v45_v21 = vmax.f32 %v41_v1, 0.0  ;;  %v47_v22 = vmul.f32 %v43_v15, %v41_v1  ;;  %s98_s6 = sshll.u32 %s201_s1, 4  ;;  %s99_s6 = int_to_ptr.vmem [resolvable:$true] %s98_s6 }
  0x29   :  { %v52_v4 = vsub.f32 0.0, %v50_v2  ;;  %v53_v5 = vsub.f32 0.0, %v51_v3  ;;  %s169_s7 = scalar_lea.vmem %s99_s6, 128  ;;  %p174_p3 = scmp.lt.s32.totalorder %s99_s6, %s99_s6 }
  0x2a   :  { %v48_v26 = vsub.f32 %v44_v17, %v46_v18  ;;  %v49_v29 = vsub.f32 %v45_v21, %v47_v22  ;;  %p170_p2 = scmp.ne.s32.totalorder %s99_s6, %s169_s7  ;;  %p175_p4 = scmp.lt.s32.totalorder %s169_s7, %s169_s7 }
  0x2b   :  { %v54_v6 = vmul.f32 1.442695, %v52_v4  ;;  %v56_v7 = vmul.f32 1.442695, %v53_v5 }
  0x2c   :  { %p176_p5 = por %p175_p4, %p174_p3 }
  0x2d   :  { %113 = vpow2.f32 %v54_v6 }
  0x2e   :  { %115 = vpow2.f32 %v56_v7  ;;  %p177_p6 = pnand %p176_p5, %p170_p2 }
  0x37   :  { %v114_v8 = vpop.eup %113 }
  0x38   :  { %v116_v9 = vpop.eup %115  ;;  %v58_v10 = vadd.f32 1.0, %v114_v8  ;;  %v61_v12 = vmul.f32 -0.5, %v114_v8  ;;  %v64_v19 = vand.u32 2147483647, %v114_v8 }
  0x39   :  { %v67_v11 = vadd.f32 1.0, %v116_v9  ;;  %v70_v13 = vmul.f32 -0.5, %v116_v9  ;;  %v73_v23 = vand.u32 2147483647, %v116_v9 }
  0x3a   :  { %117 = vlog2.f32 %v58_v10  ;;  %v62_v16 = vadd.f32 1.0, %v61_v12  ;;  %vm65_vm0 = vcmp.lt.f32.partialorder %v64_v19, 0.0004427343 }
  0x3b   :  { %119 = vlog2.f32 %v67_v11  ;;  %v71_v20 = vadd.f32 1.0, %v70_v13  ;;  %vm74_vm1 = vcmp.lt.f32.partialorder %v73_v23, 0.0004427343 }
  0x3c   :  { %v63_v24 = vmul.f32 %v114_v8, %v62_v16 }
  0x3d   :  { %v72_v27 = vmul.f32 %v116_v9, %v71_v20 }
  0x44   :  { %v118_v25 = vpop.eup %117 }
  0x45   :  { %v120_v28 = vpop.eup %119  ;;  %v60_v30 = vmul.f32 0.6931472, %v118_v25 }
  0x46   :  { %v69_v31 = vmul.f32 0.6931472, %v120_v28 }
  0x47   :  { %v66_v32 = vsel %vm65_vm0, %v63_v24, %v60_v30 }
  0x48   :  { %v75_v33 = vsel %vm74_vm1, %v72_v27, %v69_v31  ;;  %v76_v34 = vadd.f32 %v66_v32, %v48_v26 }
  0x49   :  { %v77_v35 = vadd.f32 %v75_v33, %v49_v29 }
  0x4a   :  { %v78_v36 = vsub.f32 0.0, %v76_v34 }
  0x4b   :  { %v79_v37 = vsub.f32 0.0, %v77_v35 }
  0x4c   :  { %v80_v38 = vmul.f32 1.442695, %v78_v36 }
  0x4d   :  { %v82_v39 = vmul.f32 1.442695, %v79_v37 }
  0x4e   :  { %121 = vpow2.f32 %v80_v38 }
  0x4f   :  { %123 = vpow2.f32 %v82_v39 }
  0x58   :  { %v122_v40 = vpop.eup %121 }
  0x59   :  { %v124_v41 = vpop.eup %123  ;;  %v84_v42 = vsub.f32 1.0, %v122_v40 }
  0x5a   :  { %v85_v43 = vsub.f32 1.0, %v124_v41 }
  0x5b   :  { %v86_v44 = vmul.f32 %v84_v42, %v84_v42 }
  0x5c   :  { %v87_v45 = vmul.f32 %v85_v43, %v85_v43 }
  0x5d   :  { %v88_v46 = vmul.f32 %v86_v44, %v76_v34 }
  0x5e   :  { %v89_v47 = vmul.f32 %v87_v45, %v77_v35 }
  0x60   :  { %v90_v48 = vadd.f32 %v89_v47, %v88_v46 }
  0x62   :  { %91 = vst [vmem:[#allocation7] sm:$0xff] %v90_v48 }
  0x63   :  { %180 = shalt.err (!%p177_p6)
}
  0x64   :  { %s181_s10 = scalar_lea.hbm %s255_s2, 128 }
  0x65   :  { %p182_p7 = scmp.ne.s32.totalorder %s255_s2, %s181_s10  ;;  %p185_p8 = scmp.lt.u32.totalorder %s181_s10, %s255_s2 }
  0x67   :  { %p187_p9 = pnand %p185_p8, %p182_p7 }
  0x69   :  { %190 = shalt.err (!%p187_p9)
}
  0x6a   :  { %101 = dma.vmem_to_hbm [thread:$0]  %s99_s6, 128, %s255_s2, [#allocation4]  }
  0x6b   :  { %195 = dma.done.wait [#allocation4], 128  }
  0x6c   :  { %196 = vsyncadd [#allocation4], 4294967168 }
  0x6d   :  { %105 = vsyncpa [#allocation3], 1 }
  0x6e   :  { %106 = vsyncpa [#allocation6], 1 }
  0x6f   :  { %107 = vsyncpa [#allocation4], 1 }

</bundles_post_ra>
